<compile_context>
chip_gen: v7x
topology: tpu7x:2x2x1
jax: 0.10.0
libtpu: 0.0.40
codegen_flags: <defaults>
</compile_context>

<pallas_src>
import functools

import jax
import jax.numpy as jnp
from jax import lax
from jax.experimental import pallas as pl
from jax.experimental.pallas import tpu as pltpu


# ----------------------------------------------------------------------------
# Generation detection / budgets
# ----------------------------------------------------------------------------
def _tpu_generation():
    try:
        kind = jax.devices()[0].device_kind.lower()
    except Exception:
        return "unknown"
    if "v7" in kind or "7x" in kind:
        return "v7x"
    if "v6" in kind:
        return "v6e"
    if "v5" in kind:
        return "v5e" if ("lite" in kind or "v5e" in kind) else "v5p"
    return "unknown"


_BF16_FAST = frozenset({"v6e", "v7x"})           # bf16 MXU/VPU paths worth it
_VMEM_LIMIT = {                                   # scoped VMEM limit to request
    "v7x": 48 << 20,                              # 64 MiB physical per TC
    "v6e": 64 << 20,                              # 128 MiB physical
    "v5e": 64 << 20,                              # 128 MiB physical
    "v5p": 64 << 20,
}
_DEFAULT_VMEM_LIMIT = 32 << 20


def _ceil_to(n, m):
    return -(-n // m) * m


def _pick_tq(H, W, C, cpg, n_head, x_bytes, vmem_budget_bytes):
    """Largest lane-aligned output-pixel tile whose working set fits the budget."""
    HW = H * W

    def estimate(tq):
        x_block = 2 * _ceil_to(C * H, 8) * _ceil_to(W, 128) * x_bytes   # resident image, dbl-buf
        samp = 2 * _ceil_to(2 * n_head, 8) * tq * 4                     # coord tiles, dbl-buf
        out = 2 * _ceil_to(C, 8) * tq * 4                               # output tiles, dbl-buf
        tmps = (_ceil_to(W, 8) + _ceil_to(H, 8)
                + 2 * _ceil_to(cpg * H, 8) + _ceil_to(C, 8)) * tq * 4   # tx, ty, z, product, acc
        return x_block + samp + out + int(1.5 * tmps)

    candidates = [t for t in (1024, 512, 256, 128) if HW % t == 0]
    if not candidates:
        # TODO(synk): pad/mask the pixel axis instead of a single ragged tile.
        candidates = [HW]
    for tq in candidates:
        if estimate(tq) <= vmem_budget_bytes:
            return tq
    return candidates[-1]


# ----------------------------------------------------------------------------
# Kernel: separable bilinear backward warp over an output-pixel tile
# ----------------------------------------------------------------------------
def _defconv_warp_kernel(samp_ref, x_ref, o_ref, *, H, W, n_head, cpg):
    # samp_ref: (1, 2*n_head, TQ)  pre-clamped sample coords (xs, ys per head), f32
    # x_ref:    (1, C*H, W)        full image rows, resident across pixel tiles
    # o_ref:    (1, C, TQ)         lane-dense output tile
    TQ = o_ref.shape[2]

    # Grid-invariant source-axis coordinates (no pixel iota / div / mod needed).
    sx = lax.broadcasted_iota(jnp.int32, (W, 1), 0).astype(jnp.float32)   # (W, 1)
    sy = lax.broadcasted_iota(jnp.int32, (H, 1), 0).astype(jnp.float32)   # (H, 1)

    head_outs = []
    for hd in range(n_head):
        xs = samp_ref[0, 2 * hd:2 * hd + 1, :]          # (1, TQ), clamped to [0, W-1]
        ys = samp_ref[0, 2 * hd + 1:2 * hd + 2, :]      # (1, TQ), clamped to [0, H-1]

        # Separable tent weights; their product is exactly the border-clamped
        # bilinear gather weight from source (sy, sx) to output pixel q.
        tx = jnp.maximum(1.0 - jnp.abs(sx - xs), 0.0)   # (W, TQ) f32
        ty = jnp.maximum(1.0 - jnp.abs(sy - ys), 0.0)   # (H, TQ) f32

        # Stage 1 (MXU): contract the width axis for all cpg*H image rows.
        xg = x_ref[0, hd * cpg * H:(hd + 1) * cpg * H, :]            # (cpg*H, W)
        z = jnp.dot(xg, tx.astype(xg.dtype),
                    preferred_element_type=jnp.float32)              # (cpg*H, TQ) f32

        # Stage 2 (VPU multiply + XLU reduce): contract the height axis.
        res = jnp.sum(z.reshape(cpg, H, TQ) * ty[None, :, :], axis=1)  # (cpg, TQ)
        head_outs.append(res)

    out = head_outs[0] if n_head == 1 else jnp.concatenate(head_outs, axis=0)  # (C, TQ)
    o_ref[0, :, :] = out.astype(o_ref.dtype)            # one full-width store per tile


# ----------------------------------------------------------------------------
# Wrapper
# ----------------------------------------------------------------------------
def defconv_forward(x_nchw, w1, b1, w2, b2, n_head, gather_dtype=None):
    """DefConv forward.

    x_nchw: (N,C,H,W) f32; w1:(C,C), b1:(C,), w2:(2*n_head,C), b2:(2*n_head,)
    (1x1 Conv2d weights squeezed to 2D).  gather_dtype=None -> auto: bf16 on
    v6e/v7x (2x MXU, half footprint, ~1e-3 rel error), f32 elsewhere.
    """
    N, C, H, W = x_nchw.shape
    assert C % n_head == 0
    # The module's flow normalization only cancels grid_sample's
    # align_corners=True denormalization when H > 1 and W > 1.
    assert H > 1 and W > 1
    HW = H * W
    cpg = C // n_head

    gen = _tpu_generation()
    if gather_dtype is None:
        gather_dtype = jnp.bfloat16 if gen in _BF16_FAST else jnp.float32
    vmem_limit = _VMEM_LIMIT.get(gen, _DEFAULT_VMEM_LIMIT)
    x_bytes = jnp.dtype(gather_dtype).itemsize
    TQ = _pick_tq(H, W, C, cpg, n_head, x_bytes, vmem_limit - (8 << 20))

    x = jnp.asarray(x_nchw, jnp.float32)
    x_flat = x.reshape(N, C, HW)

    # ---- flow_proj (two 1x1 convs) directly in (N, C, HW) layout ------------
    w1 = jnp.asarray(w1, jnp.float32)
    w2 = jnp.asarray(w2, jnp.float32)
    hid = jax.nn.relu(
        jnp.einsum('oc,ncp->nop', w1, x_flat, precision=lax.Precision.HIGHEST)
        + jnp.asarray(b1, jnp.float32)[None, :, None])
    flow = (jnp.einsum('oc,ncp->nop', w2, hid, precision=lax.Precision.HIGHEST)
            + jnp.asarray(b2, jnp.float32)[None, :, None])        # (N, 2*n_head, HW)

    # ---- absolute, border-clamped sample coordinates (f32, done in XLA) -----
    # grid_sample(align_corners=True, border) with the module's normalization
    # reduces to: xs = clip(j + fx, 0, W-1), ys = clip(i + fy, 0, H-1).
    jj = jnp.tile(jnp.arange(W, dtype=jnp.float32), H)            # (HW,) column index
    ii = jnp.repeat(jnp.arange(H, dtype=jnp.float32), W)          # (HW,) row index
    fx = flow[:, 0::2, :]                                         # (N, n_head, HW)
    fy = flow[:, 1::2, :]
    xs = jnp.clip(fx + jj[None, None, :], 0.0, float(W - 1))
    ys = jnp.clip(fy + ii[None, None, :], 0.0, float(H - 1))
    samp = jnp.stack([xs, ys], axis=2).reshape(N, 2 * n_head, HW)  # (N, 2*n_head, HW)

    # Image rows in (C*H, W)-major layout (a free reshape of contiguous NCHW),
    # cast once here if the gather runs in bf16.
    x_gather = x.reshape(N, C * H, W).astype(gather_dtype)

    kernel = functools.partial(_defconv_warp_kernel, H=H, W=W,
                               n_head=n_head, cpg=cpg)

    out = pl.pallas_call(
        kernel,
        out_shape=jax.ShapeDtypeStruct((N, C, HW), jnp.float32),
        grid=(N, HW // TQ),
        in_specs=[
            # per-tile clamped sample coordinates, pixel axis last (lane-aligned)
            pl.BlockSpec((1, 2 * n_head, TQ), lambda b, q: (b, 0, q)),
            # full image: constant block index along the pixel-tile axis so it
            # is DMA'd once per batch element and stays VMEM-resident.
            pl.BlockSpec((1, C * H, W), lambda b, q: (b, 0, 0)),
        ],
        out_specs=pl.BlockSpec((1, C, TQ), lambda b, q: (b, 0, q)),
        compiler_params=pltpu.CompilerParams(
            # Both axes parallel: with small N the pixel-tile axis still feeds
            # the second TensorCore on v7x.
            dimension_semantics=("parallel", "parallel"),
            vmem_limit_bytes=vmem_limit,
        ),
    )(samp, x_gather)

    return out.reshape(N, C, H, W)


# ----------------------------------------------------------------------------
# Pure-JAX reference matching the PyTorch forward semantics (NCHW)
# ----------------------------------------------------------------------------
def defconv_reference(x_nchw, w1, b1, w2, b2, n_head):
    N, C, H, W = x_nchw.shape
    cpg = C // n_head
    hid = jax.nn.relu(jnp.einsum('oc,nchw->nohw', w1, x_nchw,
                                 precision=lax.Precision.HIGHEST)
                      + b1[None, :, None, None])
    flow = (jnp.einsum('oc,nchw->nohw', w2, hid,
                       precision=lax.Precision.HIGHEST)
            + b2[None, :, None, None])

    inp = x_nchw.reshape(N * n_head, cpg, H, W)
    fl = flow.reshape(N * n_head, 2, H, W)

    jj = jnp.arange(W, dtype=jnp.float32)[None, None, :]
    ii = jnp.arange(H, dtype=jnp.float32)[None, :, None]
    xs = jnp.clip(jj + fl[:, 0], 0.0, W - 1.0)
    ys = jnp.clip(ii + fl[:, 1], 0.0, H - 1.0)
    x0f = jnp.floor(xs)
    y0f = jnp.floor(ys)
    wx = xs - x0f
    wy = ys - y0f
    x0 = x0f.astype(jnp.int32)
    y0 = y0f.astype(jnp.int32)
    x1 = jnp.minimum(x0 + 1, W - 1)
    y1 = jnp.minimum(y0 + 1, H - 1)

    flat = inp.reshape(N * n_head, cpg, H * W)

    def gather(yi, xi):
        idx = (yi * W + xi).reshape(N * n_head, 1, H * W)
        return jnp.take_along_axis(flat, idx, axis=2).reshape(N * n_head, cpg, H, W)

    v00, v01 = gather(y0, x0), gather(y0, x1)
    v10, v11 = gather(y1, x0), gather(y1, x1)
    wx_, wy_ = wx[:, None], wy[:, None]
    out = ((1 - wy_) * ((1 - wx_) * v00 + wx_ * v01)
           + wy_ * ((1 - wx_) * v10 + wx_ * v11))
    return out.reshape(N, C, H, W)


if __name__ == "__main__":
    N, C, H, W = 2, 4, 16, 16
    n_head = 2

    key = jax.random.PRNGKey(0)
    kx, k1, k2, k3, k4 = jax.random.split(key, 5)

    x = jax.random.normal(kx, (N, C, H, W), dtype=jnp.float32)
    # flow_proj parameters (Conv2d 1x1 weights squeezed to 2D)
    w1 = 0.2 * jax.random.normal(k1, (C, C), dtype=jnp.float32)
    b1 = 0.1 * jax.random.normal(k2, (C,), dtype=jnp.float32)
    w2 = 0.5 * jax.random.normal(k3, (2 * n_head, C), dtype=jnp.float32)
    b2 = 0.5 * jax.random.normal(k4, (2 * n_head,), dtype=jnp.float32)

    ref = defconv_reference(x, w1, b1, w2, b2, n_head)

    # Strict check against the f32 PyTorch-equivalent reference.
    out = jax.block_until_ready(
        defconv_forward(x, w1, b1, w2, b2, n_head, gather_dtype=jnp.float32))
    assert out.shape == (N, C, H, W)
    assert jnp.allclose(out, ref, atol=1e-4, rtol=1e-4), "f32 mismatch vs reference"

    # Auto mode (bf16 gather on v6e/v7x, f32 elsewhere) -- looser tolerance.
    out_auto = jax.block_until_ready(defconv_forward(x, w1, b1, w2, b2, n_head))
    assert jnp.allclose(out_auto, ref, atol=5e-2, rtol=5e-2), "auto-dtype mismatch"

    print("KERNEL_OK")
</pallas_src>

<mosaic_0001>
module attributes {stable_mosaic.version = 11 : i64} {
  func.func @_defconv_warp_kernel(%arg0: i32, %arg1: i32, %arg2: memref<1x4x256xf32, #tpu.memory_space<vmem>>, %arg3: memref<1x64x16xf32, #tpu.memory_space<vmem>>, %arg4: memref<1x4x256xf32, #tpu.memory_space<vmem>>) attributes {dimension_semantics = [#tpu.dimension_semantics<parallel>, #tpu.dimension_semantics<parallel>], iteration_bounds = array<i64: 2, 1>, scalar_prefetch = 0 : i64, scratch_operands = 0 : i64, tpu.core_type = #tpu.core_type<tc>, window_params = [{transform_indices = @transform_0, window_bounds = array<i64: 1, 4, 256>}, {transform_indices = @transform_1, window_bounds = array<i64: 1, 64, 16>}, {transform_indices = @transform_2, window_bounds = array<i64: 1, 4, 256>}]} {
    %0 = tpu.iota {dimensions = array<i32: 0>} : vector<16x1xi32>
    %1 = arith.sitofp %0 : vector<16x1xi32> to vector<16x1xf32>
    %2 = tpu.iota {dimensions = array<i32: 0>} : vector<16x1xi32>
    %3 = arith.sitofp %2 : vector<16x1xi32> to vector<16x1xf32>
    %c0 = arith.constant 0 : index
    %c0_0 = arith.constant 0 : index
    %c0_1 = arith.constant 0 : index
    %4 = vector.load %arg2[%c0, %c0_0, %c0_1] : memref<1x4x256xf32, #tpu.memory_space<vmem>>, vector<1x1x256xf32>
    %5 = vector.shape_cast %4 : vector<1x1x256xf32> to vector<1x256xf32>
    %c0_2 = arith.constant 0 : index
    %c1 = arith.constant 1 : index
    %c0_3 = arith.constant 0 : index
    %6 = vector.load %arg2[%c0_2, %c1, %c0_3] : memref<1x4x256xf32, #tpu.memory_space<vmem>>, vector<1x1x256xf32>
    %7 = vector.shape_cast %6 : vector<1x1x256xf32> to vector<1x256xf32>
    %8 = vector.broadcast %1 : vector<16x1xf32> to vector<16x256xf32>
    %9 = vector.broadcast %5 : vector<1x256xf32> to vector<16x256xf32>
    %10 = arith.subf %8, %9 : vector<16x256xf32>
    %11 = math.absf %10 : vector<16x256xf32>
    %cst = arith.constant 1.000000e+00 : f32
    %12 = vector.broadcast %cst : f32 to vector<16x256xf32>
    %13 = arith.subf %12, %11 : vector<16x256xf32>
    %cst_4 = arith.constant 0.000000e+00 : f32
    %14 = vector.broadcast %cst_4 : f32 to vector<16x256xf32>
    %15 = arith.maximumf %13, %14 : vector<16x256xf32>
    %16 = vector.broadcast %3 : vector<16x1xf32> to vector<16x256xf32>
    %17 = vector.broadcast %7 : vector<1x256xf32> to vector<16x256xf32>
    %18 = arith.subf %16, %17 : vector<16x256xf32>
    %19 = math.absf %18 : vector<16x256xf32>
    %cst_5 = arith.constant 1.000000e+00 : f32
    %20 = vector.broadcast %cst_5 : f32 to vector<16x256xf32>
    %21 = arith.subf %20, %19 : vector<16x256xf32>
    %cst_6 = arith.constant 0.000000e+00 : f32
    %22 = vector.broadcast %cst_6 : f32 to vector<16x256xf32>
    %23 = arith.maximumf %21, %22 : vector<16x256xf32>
    %c0_7 = arith.constant 0 : index
    %c0_8 = arith.constant 0 : index
    %c0_9 = arith.constant 0 : index
    %24 = vector.load %arg3[%c0_7, %c0_8, %c0_9] : memref<1x64x16xf32, #tpu.memory_space<vmem>>, vector<1x32x16xf32>
    %25 = vector.shape_cast %24 : vector<1x32x16xf32> to vector<32x16xf32>
    %cst_10 = arith.constant dense<0.000000e+00> : vector<32x256xf32>
    %26 = tpu.matmul %25, %15, %cst_10 {dimension_numbers = #tpu.dot_dimension_numbers<[1], [0], [0], [1], [0, 0, 1, 1], [], []>} : vector<32x16xf32>, vector<16x256xf32>, vector<32x256xf32> -> vector<32x256xf32>
    %27 = vector.shape_cast %26 : vector<32x256xf32> to vector<2x16x256xf32>
    %28 = vector.shape_cast %23 : vector<16x256xf32> to vector<1x16x256xf32>
    %29 = vector.broadcast %28 : vector<1x16x256xf32> to vector<2x16x256xf32>
    %30 = arith.mulf %27, %29 : vector<2x16x256xf32>
    %cst_11 = arith.constant dense<0.000000e+00> : vector<2x256xf32>
    %31 = vector.multi_reduction <add>, %30, %cst_11 [1] : vector<2x16x256xf32> to vector<2x256xf32>
    %c0_12 = arith.constant 0 : index
    %c2 = arith.constant 2 : index
    %c0_13 = arith.constant 0 : index
    %32 = vector.load %arg2[%c0_12, %c2, %c0_13] : memref<1x4x256xf32, #tpu.memory_space<vmem>>, vector<1x1x256xf32>
    %33 = vector.shape_cast %32 : vector<1x1x256xf32> to vector<1x256xf32>
    %c0_14 = arith.constant 0 : index
    %c3 = arith.constant 3 : index
    %c0_15 = arith.constant 0 : index
    %34 = vector.load %arg2[%c0_14, %c3, %c0_15] : memref<1x4x256xf32, #tpu.memory_space<vmem>>, vector<1x1x256xf32>
    %35 = vector.shape_cast %34 : vector<1x1x256xf32> to vector<1x256xf32>
    %36 = vector.broadcast %1 : vector<16x1xf32> to vector<16x256xf32>
    %37 = vector.broadcast %33 : vector<1x256xf32> to vector<16x256xf32>
    %38 = arith.subf %36, %37 : vector<16x256xf32>
    %39 = math.absf %38 : vector<16x256xf32>
    %cst_16 = arith.constant 1.000000e+00 : f32
    %40 = vector.broadcast %cst_16 : f32 to vector<16x256xf32>
    %41 = arith.subf %40, %39 : vector<16x256xf32>
    %cst_17 = arith.constant 0.000000e+00 : f32
    %42 = vector.broadcast %cst_17 : f32 to vector<16x256xf32>
    %43 = arith.maximumf %41, %42 : vector<16x256xf32>
    %44 = vector.broadcast %3 : vector<16x1xf32> to vector<16x256xf32>
    %45 = vector.broadcast %35 : vector<1x256xf32> to vector<16x256xf32>
    %46 = arith.subf %44, %45 : vector<16x256xf32>
    %47 = math.absf %46 : vector<16x256xf32>
    %cst_18 = arith.constant 1.000000e+00 : f32
    %48 = vector.broadcast %cst_18 : f32 to vector<16x256xf32>
    %49 = arith.subf %48, %47 : vector<16x256xf32>
    %cst_19 = arith.constant 0.000000e+00 : f32
    %50 = vector.broadcast %cst_19 : f32 to vector<16x256xf32>
    %51 = arith.maximumf %49, %50 : vector<16x256xf32>
    %c0_20 = arith.constant 0 : index
    %c32 = arith.constant 32 : index
    %c0_21 = arith.constant 0 : index
    %52 = vector.load %arg3[%c0_20, %c32, %c0_21] : memref<1x64x16xf32, #tpu.memory_space<vmem>>, vector<1x32x16xf32>
    %53 = vector.shape_cast %52 : vector<1x32x16xf32> to vector<32x16xf32>
    %cst_22 = arith.constant dense<0.000000e+00> : vector<32x256xf32>
    %54 = tpu.matmul %53, %43, %cst_22 {dimension_numbers = #tpu.dot_dimension_numbers<[1], [0], [0], [1], [0, 0, 1, 1], [], []>} : vector<32x16xf32>, vector<16x256xf32>, vector<32x256xf32> -> vector<32x256xf32>
    %55 = vector.shape_cast %54 : vector<32x256xf32> to vector<2x16x256xf32>
    %56 = vector.shape_cast %51 : vector<16x256xf32> to vector<1x16x256xf32>
    %57 = vector.broadcast %56 : vector<1x16x256xf32> to vector<2x16x256xf32>
    %58 = arith.mulf %55, %57 : vector<2x16x256xf32>
    %cst_23 = arith.constant dense<0.000000e+00> : vector<2x256xf32>
    %59 = vector.multi_reduction <add>, %58, %cst_23 [1] : vector<2x16x256xf32> to vector<2x256xf32>
    %60 = tpu.concatenate %31, %59 in 0 : vector<2x256xf32>, vector<2x256xf32> -> vector<4x256xf32>
    %c0_24 = arith.constant 0 : index
    %c0_25 = arith.constant 0 : index
    %c0_26 = arith.constant 0 : index
    %61 = vector.load %arg4[%c0_24, %c0_25, %c0_26] : memref<1x4x256xf32, #tpu.memory_space<vmem>>, vector<1x4x256xf32>
    %62 = vector.shape_cast %61 : vector<1x4x256xf32> to vector<4x256xf32>
    %63 = vector.shape_cast %60 : vector<4x256xf32> to vector<1x4x256xf32>
    tpu.vector_store %arg4[%c0_24, %c0_25, %c0_26], %63 {strides = array<i32>} : memref<1x4x256xf32, #tpu.memory_space<vmem>>, vector<1x4x256xf32>,
    return
  }
  func.func @transform_0(%arg0: i32, %arg1: i32) -> (i32, i32, i32) {
    %c0_i32 = arith.constant 0 : i32
    %c0_i32_0 = arith.constant 0 : i32
    return %arg0, %c0_i32, %arg1 : i32, i32, i32
  }
  func.func @transform_1(%arg0: i32, %arg1: i32) -> (i32, i32, i32) {
    %c0_i32 = arith.constant 0 : i32
    %c0_i32_0 = arith.constant 0 : i32
    %c0_i32_1 = arith.constant 0 : i32
    return %arg0, %c0_i32, %c0_i32_0 : i32, i32, i32
  }
  func.func @transform_2(%arg0: i32, %arg1: i32) -> (i32, i32, i32) {
    %c0_i32 = arith.constant 0 : i32
    %c0_i32_0 = arith.constant 0 : i32
    return %arg0, %c0_i32, %arg1 : i32, i32, i32
  }
}

</mosaic_0001>

<bundles_post_ra>
// kernel: tpu_custom_call.1
= control target key start
LH: loop header
LB: loop body
LE: loop exit
PB: predicated region body
PF: predicated region fallthrough
CT: control target
= control target key end

     0   :  { %7 = vsyncpa [#allocation3], 0  ;;  %s1107_s0 = inlined_call_operand.vmem [shape: f32[2,4,256], index: 0, kind: input, shape index: {}]   ;;  %s1108_s1 = inlined_call_operand.vmem [shape: f32[2,64,16], index: 1, kind: input, shape index: {}]   ;;  %s1109_s2 = inlined_call_operand.hbm [shape: f32[2,4,256], index: 2, kind: output, shape index: {}]  }
   0x1   :  { %9 = vsyncpa [#allocation3 + $0x1], 0  ;;  %s917_s9 = smov 0   ;;  %s919_s10 = smov 0  }
   0x2   :  { %s921_s11 = smov 0   ;;  %s923_s12 = smov 0  }
   0x3   :  { %s925_s13 = smov 0   ;;  %s927_s14 = smov 0  }
   0x4 LB: > { %s727_s15 = sadd.s32 4294967295, %s898_s14   ;;  %s728_s16 = sadd.s32 4294967294, %s898_s14   ;;  %s898_s14 = sphi %s927_s14, %s15_s14   ;;  %s894_s13 = sphi %s925_s13, %s1116_s13   ;;  %s890_s12 = sphi %s923_s12, %s1115_s12   ;;  %s886_s11 = sphi %s921_s11, %s1114_s11   ;;  %s882_s10 = sphi %s919_s10, %s1113_s10   ;;  %s878_s9 = sphi %s917_s9, %s1112_s9  }
   0x5   : > { %s27_s17 = sadd.s32 1, %s894_s13  ;;  %s90_s18 = sadd.s32 1, %s886_s11 }
   0x6   : > { %p29_p0 = scmp.ge.s32.totalorder %s27_s17, 2  ;;  %p100_p1 = scmp.ne.s32.totalorder %s886_s11, %s882_s10 }
   0x7   : > { %p101_p2 = scmp.eq.s32.totalorder %s727_s15, 1  ;;  %p106_p3 = scmp.ne.s32.totalorder %s882_s10, %s878_s9 }
   0x8   : > { %s1118_s17 = smov (%p29_p0, %s27_s17), 0  ;;  %p107_p5 = scmp.eq.s32.totalorder %s728_s16, 1 }
   0x9   : > { %p957_p4 = por %p101_p2, %p100_p1  ;;  %s85_s20 = ssub.s32 %s894_s13, %s1118_s17 }
   0xa   : > { %p731_p6 = scmp.ge.s32.totalorder %s898_s14, 1  ;;  %p88_p7 = scmp.eq.s32.totalorder %s85_s20, 0 }
   0xb   : > { %p964_p8 = por %p107_p5, %p106_p3  ;;  %p146_p9 = scmp.lt.s32.totalorder %s898_s14, 3 }
   0xc   : > { %s970_s22 = scalar_select %p88_p7, %s886_s11, %s90_s18  }
   0xd   : > { %p147_p10 = pnand %p731_p6, %p146_p9 }
   0xe   : > { %p178_p11 = scmp.lt.s32.totalorder (!%p147_p10), %s890_s12, 1  ;;  %v193_v0 = vlaneseq (!%p147_p10)  ;;  %v900_v1 = vmov (!%p147_p10), 0.0   ;;  %vm259_vm0 = vcmask (!%p147_p10), 130048   ;;  %s174_s4 = sand.u32 (!%p147_p10), 1, %s882_s10   ;;  %vm600_vm1 = vcmask (!%p147_p10), 1041409  }
   0xf   : > { %150 = sbr.rel (%p147_p10) target bundleno = 304 (0x130), region = 28  ;;  %336 = vmatprep.mubr.f32.mxu0 (!%p147_p10), %v900_v1  ;;  %535 = vmatprep.mubr.f32.mxu1 (!%p147_p10), %v900_v1  ;;  %s1051_s5 = sshll.u32 (!%p147_p10), %s174_s4, 3  ;;  %vm609_vm2 = vcmask (!%p147_p10), 1043459   ;;  %vm614_vm3 = vcmask (!%p147_p10), 1041408  }
  0x10   : > { %v194_v2 = vshrl.u32 (!%p147_p10), %v193_v0, 7  ;;  %s755_s6 = sshll.u32 (!%p147_p10), %s890_s12, 7  ;;  %s176_s7 = scalar_lea.vmem (!%p147_p10), [#allocation2], %s1051_s5 }
  0x11   : > { %s639_s8 = sshll.u32 (!%p147_p10), %s176_s7, 4  ;;  %s1058_s18 = scalar_lea.hbm (!%p147_p10), %s1109_s2, %s755_s6  ;;  %s1060_s8 = int_to_ptr.vmem [resolvable:$true] %s639_s8 }
  0x12   : > { %v195_v3 = vadd.s32 (!%p147_p10), 8, %v194_v2  ;;  %v979_v4 = vsub.s32 (!%p147_p10), 1, %v194_v2  ;;  %v981_v5 = vsub.s32 (!%p147_p10), 0, %v194_v2  ;;  %v988_v6 = vcvt.s32.f32 (!%p147_p10), %v194_v2  ;;  %s623_s20 = scalar_lea.sflag (!%p147_p10), [#allocation3], %s174_s4 }
  0x14   : > { %v990_v7 = vcvt.s32.f32 (!%p147_p10), %v195_v3 }
  0x16   : > { %s976_s23 = scalar_select %p178_p11, %s890_s12, 1 }
  0x17   : > { %s820_s12 = scalar_lea.vmem %s1060_s8, 128 }
  0x18   : > { %s753_s24 = sshll.u32 %s976_s23, 3  ;;  %s754_s28 = sshll.u32 %s976_s23, 6 }
  0x19   : > { %s986_s27 = scalar_lea.vmem %s1107_s0, %s753_s24  ;;  %s1010_s3 = scalar_lea.vmem %s1108_s1, %s754_s28 }
  0x1a   : > { %v198_v8 = vld [vmem:[%s986_s27] ss:$4 sm:$0x3]  ;;  %v742_v9 = vld [vmem:[%s986_s27 + $0x2] ss:$4 sm:$0x3]  ;;  %p821_p12 = scmp.ne.s32.totalorder %s1060_s8, %s820_s12 }
  0x1b   : > { %v209_v10 = vrot.slane %v198_v8, %v979_v4  ;;  %v409_v11 = vrot.slane %v742_v9, %v979_v4  ;;  %v205_v12 = vrot.slane %v198_v8, %v981_v5  ;;  %v405_v13 = vrot.slane %v742_v9, %v981_v5  ;;  %v255_v50 = vld [vmem:[%s1010_s3] sm:$0xff]  ;;  %v256_v52 = vld [vmem:[%s1010_s3 + $0x8] sm:$0xff]  ;;  %v257_v54 = vld [vmem:[%s1010_s3 + $0x10] sm:$0xff]  ;;  %s901_s23 = smov [#allocation2]  }
  0x1c   : > { %v455_v51 = vld [vmem:[%s1010_s3 + $0x20] sm:$0xff]  ;;  %v456_v53 = vld [vmem:[%s1010_s3 + $0x28] sm:$0xff]  ;;  %v457_v55 = vld [vmem:[%s1010_s3 + $0x30] sm:$0xff]  ;;  %p822_p13 = pnand %p821_p12, %p957_p4  ;;  %s824_s24 = sshll.u32 %s901_s23, 4  ;;  %s825_s24 = int_to_ptr.vmem [resolvable:$false] %s824_s24 }
  0x1d   : > { %v213_v14 = vsub.f32 %v988_v6, %v209_v10  ;;  %v215_v15 = vsub.f32 %v990_v7, %v209_v10  ;;  %v413_v16 = vsub.f32 %v988_v6, %v409_v11  ;;  %v415_v17 = vsub.f32 %v990_v7, %v409_v11  ;;  %v258_v56 = vld [vmem:[%s1010_s3 + $0x18] sm:$0xff]  ;;  %v737_v58 = vld [vmem:[%s986_s27 + $0x1] ss:$4 sm:$0x3]  ;;  %s826_s25 = scalar_lea.vmem %s825_s24, 256  ;;  %p827_p1 = scmp.lt.s32.totalorder %s1060_s8, %s825_s24 }
  0x1e   : > { %v212_v18 = vsub.f32 %v988_v6, %v205_v12  ;;  %v214_v19 = vsub.f32 %v990_v7, %v205_v12  ;;  %v412_v20 = vsub.f32 %v988_v6, %v405_v13  ;;  %v414_v21 = vsub.f32 %v990_v7, %v405_v13  ;;  %v458_v57 = vld [vmem:[%s1010_s3 + $0x38] sm:$0xff]  ;;  %v743_v59 = vld [vmem:[%s986_s27 + $0x3] ss:$4 sm:$0x3]  ;;  %p823_p0 = pneg %p822_p13  ;;  %p828_p2 = scmp.lt.s32.totalorder %s826_s25, %s820_s12 }
  0x1f   : > { %v217_v22 = vand.u32 2147483647, %v213_v14  ;;  %v219_v23 = vand.u32 2147483647, %v215_v15  ;;  %v417_v24 = vand.u32 2147483647, %v413_v16  ;;  %v232_v60 = vrot.slane %v737_v58, %v981_v5 }
  0x20   : > { %v419_v25 = vand.u32 2147483647, %v415_v17  ;;  %v216_v26 = vand.u32 2147483647, %v212_v18  ;;  %v218_v27 = vand.u32 2147483647, %v214_v19  ;;  %v236_v61 = vrot.slane %v737_v58, %v979_v4  ;;  %p829_p3 = por %p828_p2, %p827_p1 }
  0x21   : > { %v221_v28 = vsub.f32 1.0, %v217_v22  ;;  %v223_v29 = vsub.f32 1.0, %v219_v23  ;;  %v421_v30 = vsub.f32 1.0, %v417_v24  ;;  %v416_v31 = vand.u32 2147483647, %v412_v20 }
  0x22   : > { %v423_v32 = vsub.f32 1.0, %v419_v25  ;;  %v220_v33 = vsub.f32 1.0, %v216_v26  ;;  %v222_v34 = vsub.f32 1.0, %v218_v27  ;;  %v418_v35 = vand.u32 2147483647, %v414_v21  ;;  %p830_p5 = pnand %p829_p3, %p823_p0 }
  0x23   : > { %v225_v36 = vmax.f32 %v221_v28, 0.0  ;;  %v227_v37 = vmax.f32 %v223_v29, 0.0  ;;  %v425_v38 = vmax.f32 %v421_v30, 0.0  ;;  %v420_v39 = vsub.f32 1.0, %v416_v31 }
  0x24   : > { %v427_v40 = vmax.f32 %v423_v32, 0.0  ;;  %v224_v41 = vmax.f32 %v220_v33, 0.0  ;;  %v226_v42 = vmax.f32 %v222_v34, 0.0  ;;  %v422_v43 = vsub.f32 1.0, %v418_v35 }
  0x25   : > { %v756_v44 = vpack.c.bf16 %v227_v37, %v225_v36  ;;  %v424_v45 = vmax.f32 %v420_v39, 0.0  ;;  %v432_v62 = vrot.slane %v743_v59, %v981_v5  ;;  %v436_v63 = vrot.slane %v743_v59, %v979_v4 }
  0x26   : > { %v760_v46 = vpack.c.bf16 %v427_v40, %v425_v38  ;;  %v758_v47 = vpack.c.bf16 %v226_v42, %v224_v41  ;;  %v426_v48 = vmax.f32 %v422_v43, 0.0  ;;  %v239_v0 = vsub.f32 %v988_v6, %v232_v60 }
  0x27   : > { %757 = vmatprep.subr.bf16.mxu0 %v756_v44  ;;  %v241_v2 = vsub.f32 %v990_v7, %v232_v60  ;;  %v242_v3 = vsub.f32 %v990_v7, %v236_v61  ;;  %v439_v8 = vsub.f32 %v988_v6, %v432_v62  ;;  %v441_v9 = vsub.f32 %v990_v7, %v432_v62 }
  0x28   : > { %761 = vmatprep.subr.bf16.mxu1 %v760_v46  ;;  %759 = vmatpush1.bf16.msra.mxu0 %v758_v47  ;;  %v762_v49 = vpack.c.bf16 %v426_v48, %v424_v45  ;;  %v440_v10 = vsub.f32 %v988_v6, %v436_v63  ;;  %v442_v11 = vsub.f32 %v990_v7, %v436_v63  ;;  %v243_v12 = vand.u32 2147483647, %v239_v0 }
  0x29   : > { %v245_v5 = vand.u32 2147483647, %v241_v2  ;;  %v246_v4 = vand.u32 2147483647, %v242_v3  ;;  %v443_v14 = vand.u32 2147483647, %v439_v8 }
  0x2a   : > { %763 = vmatpush1.bf16.msra.mxu1 %v762_v49  ;;  %v445_v15 = vand.u32 2147483647, %v441_v9  ;;  %v444_v16 = vand.u32 2147483647, %v440_v10  ;;  %v446_v17 = vand.u32 2147483647, %v442_v11 }
  0x2b   : > { %738 = vmatmul.mubr.msk.f32.vlgmr.msra.gmra.mrb[0].mxu0 %vm259_vm0, %v255_v50  ;;  %v247_v18 = vsub.f32 1.0, %v243_v12  ;;  %v249_v19 = vsub.f32 1.0, %v245_v5  ;;  %v250_v21 = vsub.f32 1.0, %v246_v4  ;;  %v447_v22 = vsub.f32 1.0, %v443_v14 }
  0x2c   : > { %342 = vmatprep.mubr.f32.mxu0 %v900_v1  ;;  %v449_v23 = vsub.f32 1.0, %v445_v15  ;;  %v448_v25 = vsub.f32 1.0, %v444_v16  ;;  %v450_v26 = vsub.f32 1.0, %v446_v17 }
  0x2d   : > { %744 = vmatmul.mubr.msk.f32.vlgmr.msra.gmra.mrb[0].mxu1 %vm259_vm0, %v455_v51  ;;  %v253_v7 = vmax.f32 %v249_v19, 0.0  ;;  %v254_v30 = vmax.f32 %v250_v21, 0.0  ;;  %v451_v31 = vmax.f32 %v447_v22, 0.0 }
  0x2e   : > { %541 = vmatprep.mubr.f32.mxu1 %v900_v1  ;;  %v453_v33 = vmax.f32 %v449_v23, 0.0  ;;  %v452_v34 = vmax.f32 %v448_v25, 0.0  ;;  %v454_v36 = vmax.f32 %v450_v26, 0.0 }
  0x2f   : > { %739 = vmatmul.mubr.msk.f32.gmra.mrb[2].mxu0 %vm259_vm0, %v256_v52 }
  0x30   : > { %348 = vmatprep.mubr.f32.mxu0 %v900_v1 }
  0x31   : > { %745 = vmatmul.mubr.msk.f32.gmra.mrb[2].mxu1 %vm259_vm0, %v456_v53 }
  0x32   : > { %547 = vmatprep.mubr.f32.mxu1 %v900_v1 }
  0x33   : > { %740 = vmatmul.mubr.msk.f32.gmra.mrb[4].mxu0 %vm259_vm0, %v257_v54 }
  0x34   : > { %354 = vmatprep.mubr.f32.mxu0 %v900_v1 }
  0x35   : > { %746 = vmatmul.mubr.msk.f32.gmra.mrb[4].mxu1 %vm259_vm0, %v457_v55 }
  0x36   : > { %553 = vmatprep.mubr.f32.mxu1 %v900_v1  ;;  %v240_v1 = vsub.f32 %v988_v6, %v236_v61  ;;  %v251_v6 = vmax.f32 %v247_v18, 0.0 }
  0x37   : > { %741 = vmatmul.mubr.msk.f32.gmra.mrb[6].mxu0 %vm259_vm0, %v258_v56 }
  0x38   : > { %v244_v13 = vand.u32 2147483647, %v240_v1 }
  0x39   : > { %747 = vmatmul.mubr.msk.f32.gmra.mrb[6].mxu1 %vm259_vm0, %v458_v57 }
  0x3a   : > { %v248_v20 = vsub.f32 1.0, %v244_v13 }
  0x3c   : > { %v252_v29 = vmax.f32 %v248_v20, 0.0 }
  0xfe   : > { %v338_v24 = vpop.f32.mrb[0].mxu0 }
  0xff   : > { %v340_v27 = vpop.f32.mrb[1].mxu0  ;;  %v361_v37 = vmul.f32 %v338_v24, %v251_v6 }
 0x100   : > { %v537_v28 = vpop.f32.mrb[0].mxu1  ;;  %v362_v40 = vmul.f32 %v340_v27, %v252_v29 }
 0x101   : > { %v539_v32 = vpop.f32.mrb[1].mxu1  ;;  %v560_v43 = vmul.f32 %v537_v28, %v451_v31 }
 0x102   : > { %v344_v35 = vpop.f32.mrb[2].mxu0  ;;  %v561_v47 = vmul.f32 %v539_v32, %v452_v34 }
 0x103   : > { %v363_v38 = vmul.f32 %v344_v35, %v253_v7  ;;  %v346_v39 = vpop.f32.mrb[3].mxu0 }
 0x104   : > { %v543_v41 = vpop.f32.mrb[2].mxu1  ;;  %v364_v42 = vmul.f32 %v346_v39, %v254_v30 }
 0x105   : > { %v369_v44 = vadd.f32 %v363_v38, %v361_v37  ;;  %v562_v45 = vmul.f32 %v543_v41, %v453_v33  ;;  %v545_v46 = vpop.f32.mrb[3].mxu1 }
 0x106   : > { %v376_v48 = vadd.f32 %v364_v42, %v362_v40  ;;  %v563_v49 = vmul.f32 %v545_v46, %v454_v36  ;;  %v350_v50 = vpop.f32.mrb[4].mxu0 }
 0x107   : > { %v370_v51 = vrot.slane %v369_v44, 4  ;;  %v568_v52 = vadd.f32 %v562_v45, %v560_v43  ;;  %v352_v53 = vpop.f32.mrb[5].mxu0  ;;  %v365_v0 = vmul.f32 %v350_v50, %v251_v6 }
 0x108   : > { %v377_v54 = vrot.slane %v376_v48, 4  ;;  %v575_v55 = vadd.f32 %v563_v49, %v561_v47  ;;  %v549_v56 = vpop.f32.mrb[4].mxu1  ;;  %v366_v8 = vmul.f32 %v352_v53, %v252_v29 }
 0x109   : > { %v371_v57 = vadd.f32 %v370_v51, %v369_v44  ;;  %v569_v58 = vrot.slane %v568_v52, 4  ;;  %v551_v59 = vpop.f32.mrb[5].mxu1  ;;  %v564_v12 = vmul.f32 %v549_v56, %v451_v31 }
 0x10a   : > { %v378_v60 = vadd.f32 %v377_v54, %v376_v48  ;;  %v576_v61 = vrot.slane %v575_v55, 4  ;;  %v356_v62 = vpop.f32.mrb[6].mxu0  ;;  %v565_v15 = vmul.f32 %v551_v59, %v452_v34 }
 0x10b   : > { %v570_v63 = vadd.f32 %v569_v58, %v568_v52  ;;  %v367_v2 = vmul.f32 %v356_v62, %v253_v7  ;;  %v358_v1 = vpop.f32.mrb[7].mxu0  ;;  %v372_v11 = vrot.slane %v371_v57, 2 }
 0x10c   : > { %v577_v3 = vadd.f32 %v576_v61, %v575_v55  ;;  %v555_v9 = vpop.f32.mrb[6].mxu1  ;;  %v368_v10 = vmul.f32 %v358_v1, %v254_v30  ;;  %v379_v14 = vrot.slane %v378_v60, 2 }
 0x10d   : > { %v383_v5 = vadd.f32 %v367_v2, %v365_v0  ;;  %v566_v13 = vmul.f32 %v555_v9, %v453_v33  ;;  %v557_v4 = vpop.f32.mrb[7].mxu1  ;;  %v571_v18 = vrot.slane %v570_v63, 2  ;;  %v373_v24 = vadd.f32 %v372_v11, %v371_v57 }
 0x10e   : > { %v390_v16 = vadd.f32 %v368_v10, %v366_v8  ;;  %v567_v17 = vmul.f32 %v557_v4, %v454_v36  ;;  %v578_v21 = vrot.slane %v577_v3, 2  ;;  %v380_v6 = vadd.f32 %v379_v14, %v378_v60 }
 0x10f   : > { %v384_v19 = vrot.slane %v383_v5, 4  ;;  %v582_v20 = vadd.f32 %v566_v13, %v564_v12  ;;  %v572_v28 = vadd.f32 %v571_v18, %v570_v63  ;;  %v374_v34 = vrot.slane %v373_v24, 1 }
 0x110   : > { %v391_v22 = vrot.slane %v390_v16, 4  ;;  %v589_v23 = vadd.f32 %v567_v17, %v565_v15  ;;  %v579_v31 = vadd.f32 %v578_v21, %v577_v3  ;;  %v381_v37 = vrot.slane %v380_v6, 1 }
 0x111   : > { %v385_v25 = vadd.f32 %v384_v19, %v383_v5  ;;  %v583_v26 = vrot.slane %v582_v20, 4  ;;  %v573_v40 = vrot.slane %v572_v28, 1  ;;  %v375_v46 = vadd.f32 %v374_v34, %v373_v24 }
 0x112   : > { %v392_v27 = vadd.f32 %v391_v22, %v390_v16  ;;  %v590_v7 = vrot.slane %v589_v23, 4  ;;  %v580_v43 = vrot.slane %v579_v31, 1  ;;  %v382_v49 = vadd.f32 %v381_v37, %v380_v6 }
 0x113   : > { %v386_v29 = vrot.slane %v385_v25, 2  ;;  %v584_v30 = vadd.f32 %v583_v26, %v582_v20  ;;  %v574_v52 = vadd.f32 %v573_v40, %v572_v28 }
 0x114   : > { %v393_v32 = vrot.slane %v392_v27, 2  ;;  %v591_v33 = vadd.f32 %v590_v7, %v589_v23  ;;  %v581_v55 = vadd.f32 %v580_v43, %v579_v31 }
 0x115   : > { %v387_v35 = vadd.f32 %v386_v29, %v385_v25  ;;  %v585_v36 = vrot.slane %v584_v30, 2 }
 0x116   : > { %v394_v38 = vadd.f32 %v393_v32, %v392_v27  ;;  %v592_v39 = vrot.slane %v591_v33, 2 }
 0x117   : > { %v388_v41 = vrot.slane %v387_v35, 1  ;;  %v586_v42 = vadd.f32 %v585_v36, %v584_v30 }
 0x118   : > { %v395_v44 = vrot.slane %v394_v38, 1  ;;  %v593_v45 = vadd.f32 %v592_v39, %v591_v33 }
 0x119   : > { %v389_v47 = vadd.f32 %v388_v41, %v387_v35  ;;  %v587_v48 = vrot.slane %v586_v42, 1 }
 0x11a   : > { %v396_v50 = vadd.f32 %v395_v44, %v394_v38  ;;  %v594_v51 = vrot.slane %v593_v45, 1 }
 0x11b   : > { %v588_v53 = vadd.f32 %v587_v48, %v586_v42  ;;  %v601_v54 = vsel %vm600_vm1, %v389_v47, %v375_v46 }
 0x11c   : > { %v595_v56 = vadd.f32 %v594_v51, %v593_v45  ;;  %v602_v57 = vsel %vm600_vm1, %v396_v50, %v382_v49 }
 0x11d   : > { %v610_v58 = vsel %vm609_vm2, %v588_v53, %v574_v52 }
 0x11e   : > { %v611_v59 = vsel %vm609_vm2, %v595_v56, %v581_v55  ;;  %v615_v60 = vsel %vm614_vm3, %v601_v54, %v610_v58 }
 0x11f   : > { %v616_v61 = vsel %vm614_vm3, %v602_v57, %v611_v59 }
 0x120   : > { %v619_v62 = vcombine.low %v615_v60, %v616_v61 }
 0x122   : > { %621 = vst [vmem:[%s176_s7] sm:$0xff] %v619_v62 }
 0x123   : > { %833 = shalt.err (!%p830_p5)
}
 0x124   : > { %s834_s26 = scalar_lea.hbm %s1058_s18, 128  ;;  %s838_s29 = scalar_lea.hbm %s1109_s2, 256 }
 0x125   : > { %p835_p6 = scmp.ne.s32.totalorder %s1058_s18, %s834_s26  ;;  %p839_p10 = scmp.lt.u32.totalorder %s1058_s18, %s1109_s2 }
 0x126   : > { %p840_p11 = scmp.lt.u32.totalorder %s838_s29, %s834_s26  ;;  %p842_p13 = scmp.lt.u32.totalorder %s834_s26, %s1058_s18 }
 0x127   : > { %p836_p7 = pnand %p835_p6, %p957_p4 }
 0x128   : > { %p841_p12 = por %p840_p11, %p839_p10 }
 0x129   : > { %p837_p9 = pneg %p836_p7 }
 0x12a   : > { %p843_p0 = por %p842_p13, %p841_p12 }
 0x12c   : > { %p844_p1 = pnand %p843_p0, %p837_p9 }
 0x12e   : > { %847 = shalt.err (!%p844_p1)
}
 0x12f   : > { %764 = dma.vmem_to_hbm [thread:$0]  (%p957_p4), %s1060_s8, 128, %s1058_s18, %s623_s20  }
 0x130 PF: > { %p770_p2 = scmp.ge.s32.totalorder %s898_s14, 2  ;;  %s651_s4 = sand.u32 1, %s878_s9  }
 0x131   : > { %s652_s5 = scalar_lea.sflag [#allocation3], %s651_s4 }
 0x132   : > { %p767_p3 = pnand %p770_p2, %p964_p8 }
 0x134   : > { %873 = dma.done.wait (!%p767_p3), %s652_s5, 128  }
 0x135   : > { %875 = vsyncadd (!%p767_p3), %s652_s5, 4294967168  ;;  %s15_s14 = sadd.s32 1, %s898_s14   ;;  %s1112_s9 = smov %s882_s10 }
 0x136   : > { %p12_p5 = scmp.ge.s32.totalorder %s15_s14, 4   ;;  %s1113_s10 = smov %s886_s11 }
 0x137   : > { %s1114_s11 = smov %s970_s22  ;;  %s1115_s12 = smov %s894_s13 }
 0x138   : > { %s1116_s13 = smov %s1118_s17  ;;  %14 = sbr.rel (!%p12_p5) target bundleno = 4 (0x4), region = 69 }
 0x13f   :  { %657 = vsyncpa [#allocation3], 1 }
 0x140   :  { %659 = vsyncpa [#allocation3 + $0x1], 1 }

</bundles_post_ra>
